<compile_context>
chip_gen: v7x
topology: tpu7x:2x2x1
jax: 0.10.0
libtpu: 0.0.40
codegen_flags: <defaults>
</compile_context>

<pallas_src>
import functools
import math

import jax
import jax.numpy as jnp
from jax.experimental import pallas as pl
from jax.experimental.pallas import tpu as pltpu


def _round_up(x, m):
    return (x + m - 1) // m * m


_VMEM_LIMIT = 48 * 1024 * 1024   # explicit scoped-VMEM cap (safe on v5e/v6e/v7x)


# ----------------------------------------------------------------------------
# Pallas kernels
# ----------------------------------------------------------------------------
def _layernorm_kernel(x_ref, g_ref, b_ref, o_ref, *, eps):
    x = x_ref[...].astype(jnp.float32)                       # (rt, D)
    mean = jnp.mean(x, axis=-1, keepdims=True)
    xc = x - mean
    var = jnp.mean(xc * xc, axis=-1, keepdims=True)
    inv = jax.lax.rsqrt(var + eps)
    y = xc * inv * g_ref[...].astype(jnp.float32) + b_ref[...].astype(jnp.float32)
    o_ref[...] = y.astype(o_ref.dtype)


def _lstm_layer_kernel(x_ref, wih_ref, whh_ref, b_ref, o_ref,
                       h_ref, c_ref, xg_ref, *,
                       tb, n, hp, seq_len, num_blocks, reverse, unroll):
    """One LSTM layer, one direction, on phase-folded time-major rows.

      x_ref : (tb*n, Din)  -- tb LSTM timesteps, n (= stride*Bp) rows per step
      wih_ref: (Din, 4*hp), whh_ref: (hp, 4*hp), b_ref: (1, 4*hp) f32
      o_ref : (tb*n, hp)
      h_ref, c_ref: (n, hp) f32 scratch -- state persists across grid steps
      xg_ref: (tb*n, 4*hp) f32 scratch  -- whole-block input projection
    """
    gi = pl.program_id(0)
    blk = (num_blocks - 1 - gi) if reverse else gi           # block in time order

    @pl.when(gi == 0)
    def _init():
        h_ref[...] = jnp.zeros_like(h_ref)
        c_ref[...] = jnp.zeros_like(c_ref)

    # One big lane-dense MXU matmul covering all tb timesteps of this block.
    xg_ref[...] = (jnp.dot(x_ref[...], wih_ref[...],
                           preferred_element_type=jnp.float32) + b_ref[...])

    whh = whh_ref[...]
    H = hp
    base = blk * tb

    def step(t, carry):
        h, c = carry                                          # vreg-resident f32
        l = (tb - 1 - t) if reverse else t                    # in-block timestep
        valid = (base + l) < seq_len                          # boundary guard
        r0 = pl.multiple_of(l * n, 8)
        g = xg_ref[pl.ds(r0, n), :] + jnp.dot(
            h.astype(whh.dtype), whh, preferred_element_type=jnp.float32)
        # sigmoid(x) = 0.5 * tanh(0.5 * x) + 0.5  (EUP tanh, no VPU divide)
        i_g = 0.5 * jnp.tanh(0.5 * g[:, 0 * H:1 * H]) + 0.5
        f_g = 0.5 * jnp.tanh(0.5 * g[:, 1 * H:2 * H]) + 0.5
        g_g = jnp.tanh(g[:, 2 * H:3 * H])
        o_g = 0.5 * jnp.tanh(0.5 * g[:, 3 * H:4 * H]) + 0.5
        c_cand = f_g * c + i_g * g_g
        h_cand = o_g * jnp.tanh(c_cand)
        c_new = jnp.where(valid, c_cand, c)
        h_new = jnp.where(valid, h_cand, h)
        o_ref[pl.ds(r0, n), :] = h_new.astype(o_ref.dtype)    # lane-dense store
        return (h_new, c_new)

    h_fin, c_fin = jax.lax.fori_loop(0, tb, step, (h_ref[...], c_ref[...]),
                                     unroll=unroll)
    h_ref[...] = h_fin
    c_ref[...] = c_fin


def _concat_linear_kernel(*refs, num_in):
    """Fused channel-concat + 1x1 conv: out = sum_i x_i @ W_i + b."""
    xs = refs[:num_in]
    ws = refs[num_in:2 * num_in]
    b_ref = refs[2 * num_in]
    o_ref = refs[2 * num_in + 1]
    acc = jnp.dot(xs[0][...], ws[0][...], preferred_element_type=jnp.float32)
    for x_ref, w_ref in zip(xs[1:], ws[1:]):
        acc = acc + jnp.dot(x_ref[...], w_ref[...],
                            preferred_element_type=jnp.float32)
    o_ref[...] = (acc + b_ref[...]).astype(o_ref.dtype)


# ----------------------------------------------------------------------------
# Wrappers (tiling, weight packing, pallas_call plumbing)
# ----------------------------------------------------------------------------
def layer_norm_rows(x2, gamma, beta, *, eps=1e-6, vmem_budget=16 * 1024 * 1024):
    """x2: (rows, D) -> (rows, D).  Rows must be a multiple of 8."""
    rows, D = x2.shape
    bytes_per_row = 4 * 4 * D                        # in+out, double-buffered
    rt = max(8, min(1024, vmem_budget // max(1, bytes_per_row)))
    rt = _round_up(min(rt, rows), 8)
    return pl.pallas_call(
        functools.partial(_layernorm_kernel, eps=eps),
        out_shape=jax.ShapeDtypeStruct((rows, D), x2.dtype),
        grid=(pl.cdiv(rows, rt),),
        in_specs=[pl.BlockSpec((rt, D), lambda i: (i, 0)),
                  pl.BlockSpec((1, D), lambda i: (0, 0)),
                  pl.BlockSpec((1, D), lambda i: (0, 0))],
        out_specs=pl.BlockSpec((rt, D), lambda i: (i, 0)),
        compiler_params=pltpu.CompilerParams(
            dimension_semantics=("parallel",),
            vmem_limit_bytes=_VMEM_LIMIT),
    )(x2, gamma.reshape(1, D), beta.reshape(1, D))


def lstm_layer(x2, wih_t, whh_t, bias, *, n, seq_len, hp, reverse=False,
               target_rows=1024, vmem_budget=20 * 1024 * 1024):
    """One direction of one LSTM layer on phase-folded, time-major rows.

    x2: (rows_total, Din); LSTM step l uses rows [l*n, (l+1)*n).
    Returns (seq_len*n, hp) hidden states in the same row order (forward time
    order even for reverse=True); padded hidden lanes [H:hp) stay exactly 0.
    """
    rows_total, Din = x2.shape
    assert wih_t.shape[0] == Din
    L = seq_len

    # Block sizing: as many timesteps per grid step as the VMEM budget allows.
    bytes_per_row = 4 * (2 * Din + 2 * hp + 4 * hp)   # x(2x) + out(2x) + xg
    rows_blk = max(n, min(target_rows, vmem_budget // max(1, bytes_per_row)))
    tb = max(1, min(L, rows_blk // n))
    num_blocks = pl.cdiv(L, tb)

    idx = ((lambda i: (num_blocks - 1 - i, 0)) if reverse
           else (lambda i: (i, 0)))

    kern = functools.partial(
        _lstm_layer_kernel, tb=tb, n=n, hp=hp, seq_len=L,
        num_blocks=num_blocks, reverse=reverse, unroll=min(4, tb))

    return pl.pallas_call(
        kern,
        out_shape=jax.ShapeDtypeStruct((L * n, hp), x2.dtype),
        grid=(num_blocks,),
        in_specs=[
            pl.BlockSpec((tb * n, Din), idx),
            pl.BlockSpec((Din, 4 * hp), lambda i: (0, 0)),
            pl.BlockSpec((hp, 4 * hp), lambda i: (0, 0)),
            pl.BlockSpec((1, 4 * hp), lambda i: (0, 0)),
        ],
        out_specs=pl.BlockSpec((tb * n, hp), idx),
        scratch_shapes=[
            pltpu.VMEM((n, hp), jnp.float32),            # h state
            pltpu.VMEM((n, hp), jnp.float32),            # c state
            pltpu.VMEM((tb * n, 4 * hp), jnp.float32),   # block input projection
        ],
        compiler_params=pltpu.CompilerParams(
            dimension_semantics=("arbitrary",),
            vmem_limit_bytes=_VMEM_LIMIT),
    )(x2, wih_t, whh_t, bias)


def multi_layer_lstm_rows(x2, layers_packed, *, n, seq_len, hp, bidirectional):
    h = x2
    for lw in layers_packed:
        if bidirectional:
            f = lstm_layer(h, *lw[0], n=n, seq_len=seq_len, hp=hp, reverse=False)
            b = lstm_layer(h, *lw[1], n=n, seq_len=seq_len, hp=hp, reverse=True)
            h = jnp.concatenate([f, b], axis=-1)
        else:
            h = lstm_layer(h, *lw, n=n, seq_len=seq_len, hp=hp, reverse=False)
    return h


def concat_pointwise_conv_rows(xs, ws, bias, *, dout_p,
                               vmem_budget=16 * 1024 * 1024):
    """Fused concat + 1x1 conv on time-major rows: (rows, dout_p)."""
    rows = xs[0].shape[0]
    cin = sum(x.shape[1] for x in xs)
    bytes_per_row = 4 * 2 * (cin + dout_p)
    rt = max(8, min(1024, vmem_budget // max(1, bytes_per_row)))
    rt = _round_up(min(rt, rows), 8)
    in_specs = ([pl.BlockSpec((rt, x.shape[1]), lambda i: (i, 0)) for x in xs]
                + [pl.BlockSpec(w.shape, lambda i: (0, 0)) for w in ws]
                + [pl.BlockSpec((1, dout_p), lambda i: (0, 0))])
    return pl.pallas_call(
        functools.partial(_concat_linear_kernel, num_in=len(xs)),
        out_shape=jax.ShapeDtypeStruct((rows, dout_p), xs[0].dtype),
        grid=(pl.cdiv(rows, rt),),
        in_specs=in_specs,
        out_specs=pl.BlockSpec((rt, dout_p), lambda i: (i, 0)),
        compiler_params=pltpu.CompilerParams(
            dimension_semantics=("parallel",),
            vmem_limit_bytes=_VMEM_LIMIT),
    )(*xs, *ws, bias)


def _pack_dir_weights(w_ih, w_hh, b_ih, b_hh, *, hp, in_rows, in_offsets, dtype):
    """PyTorch LSTM weights -> transposed, 128-padded kernel layout.

    w_ih: (4H, Cin) with gate blocks [i, f, g, o]; input columns are scattered
    into rows of the (in_rows, 4*hp) matrix per in_offsets = [(src, dst, len)].
    """
    H = w_hh.shape[1]
    wih_t = jnp.zeros((in_rows, 4 * hp), dtype)
    whh_t = jnp.zeros((hp, 4 * hp), dtype)
    bias = jnp.zeros((1, 4 * hp), jnp.float32)
    b = (b_ih + b_hh).astype(jnp.float32)
    for g in range(4):
        src = w_ih[g * H:(g + 1) * H, :]                       # (H, Cin)
        for (s0, d0, ln) in in_offsets:
            wih_t = wih_t.at[d0:d0 + ln, g * hp:g * hp + H].set(
                jnp.transpose(src[:, s0:s0 + ln]).astype(dtype))
        whh_t = whh_t.at[:H, g * hp:g * hp + H].set(
            jnp.transpose(w_hh[g * H:(g + 1) * H, :]).astype(dtype))
        bias = bias.at[0, g * hp:g * hp + H].set(b[g * H:(g + 1) * H])
    return wih_t, whh_t, bias


def _pack_conv_weights(W, b, *, num_step, out_dim, hp, num_dirs, dout_p, dtype):
    """W: (out_dim, num_step*out_dim) -> per-step (hp*num_dirs, dout_p) slices."""
    H = out_dim // num_dirs
    ws = []
    for i in range(num_step):
        wi = jnp.zeros((hp * num_dirs, dout_p), dtype)
        for d in range(num_dirs):
            blk = W[:, i * out_dim + d * H: i * out_dim + (d + 1) * H]  # (Dout,H)
            wi = wi.at[d * hp:d * hp + H, :out_dim].set(
                jnp.transpose(blk).astype(dtype))
        ws.append(wi)
    bias = jnp.zeros((1, dout_p), jnp.float32).at[0, :out_dim].set(
        b.astype(jnp.float32))
    return ws, bias


# ----------------------------------------------------------------------------
# Module: parameter construction + forward
# ----------------------------------------------------------------------------
def init_multi_step_lstm_encoder(key, in_dim, out_dim, num_layers,
                                 num_step=1, bi_direction=False):
    H = out_dim // 2 if bi_direction else out_dim
    num_dirs = 2 if bi_direction else 1
    bound = 1.0 / math.sqrt(H)

    params = {
        "out_dim": out_dim,
        "num_step": num_step,
        "bi_direction": bi_direction,
        "ln_gamma": jnp.ones((in_dim,), jnp.float32),
        "ln_beta": jnp.zeros((in_dim,), jnp.float32),
    }

    def make_dir(k, layer_in):
        k1, k2, k3, k4 = jax.random.split(k, 4)
        w_ih = jax.random.uniform(k1, (4 * H, layer_in), minval=-bound,
                                  maxval=bound, dtype=jnp.float32)
        w_hh = jax.random.uniform(k2, (4 * H, H), minval=-bound,
                                  maxval=bound, dtype=jnp.float32)
        b_ih = jax.random.uniform(k3, (4 * H,), minval=-bound, maxval=bound,
                                  dtype=jnp.float32)
        b_hh = jax.random.uniform(k4, (4 * H,), minval=-bound, maxval=bound,
                                  dtype=jnp.float32)
        return (w_ih, w_hh, b_ih, b_hh)

    lstms = []
    for _ in range(num_step):
        layers = []
        for l in range(num_layers):
            layer_in = in_dim if l == 0 else H * num_dirs
            key, kf, kb = jax.random.split(key, 3)
            if bi_direction:
                layers.append((make_dir(kf, layer_in), make_dir(kb, layer_in)))
            else:
                layers.append(make_dir(kf, layer_in))
        lstms.append(layers)
    params["lstm"] = lstms

    cin = num_step * out_dim
    key, kw, kb2 = jax.random.split(key, 3)
    bl = 1.0 / math.sqrt(cin)
    params["linear_w"] = jax.random.uniform(kw, (out_dim, cin), minval=-bl,
                                            maxval=bl, dtype=jnp.float32)
    params["linear_b"] = jax.random.uniform(kb2, (out_dim,), minval=-bl,
                                            maxval=bl, dtype=jnp.float32)
    return params


def multi_step_lstm_encoder(params, x):
    """x: (B, T, in_dim) -> (B, T, out_dim)."""
    B, T, Din = x.shape
    out_dim = params["out_dim"]
    num_step = params["num_step"]
    bidir = params["bi_direction"]
    num_dirs = 2 if bidir else 1
    H = out_dim // num_dirs
    hp = _round_up(H, 128)            # lane-aligned hidden width (pad lanes stay 0)
    dout_p = _round_up(out_dim, 128)
    mx_dtype = x.dtype                # MXU operand dtype; pass bf16 x for bf16 MXU

    # ---- layout: pad batch to a sublane multiple and go time-major ONCE ----
    Bp = _round_up(B, 8)
    xp = x if Bp == B else jnp.pad(x, ((0, Bp - B), (0, 0), (0, 0)))
    x_tm = jnp.transpose(xp, (1, 0, 2)).reshape(T * Bp, Din)

    xn = layer_norm_rows(x_tm, params["ln_gamma"], params["ln_beta"], eps=1e-6)

    # ---- per-step phase-folded LSTM stacks (no gather/scatter copies) ----
    step_outs = []
    for i in range(num_step):
        s = i + 1
        L = T // s
        Lt = L * s
        cols = hp * num_dirs
        if L == 0:
            step_outs.append(jnp.zeros((T * Bp, cols), x.dtype))
            continue
        n = s * Bp                     # phase-folded batch of one LSTM timestep
        layers_packed = []
        for li, lp in enumerate(params["lstm"][i]):
            if li == 0:
                in_rows, offs = Din, [(0, 0, Din)]
            else:
                in_rows = hp * num_dirs
                offs = [(0, 0, H)] + ([(H, hp, H)] if bidir else [])
            if bidir:
                layers_packed.append(
                    (_pack_dir_weights(*lp[0], hp=hp, in_rows=in_rows,
                                       in_offsets=offs, dtype=mx_dtype),
                     _pack_dir_weights(*lp[1], hp=hp, in_rows=in_rows,
                                       in_offsets=offs, dtype=mx_dtype)))
            else:
                layers_packed.append(
                    _pack_dir_weights(*lp, hp=hp, in_rows=in_rows,
                                      in_offsets=offs, dtype=mx_dtype))
        h = multi_layer_lstm_rows(xn, layers_packed, n=n, seq_len=L,
                                  hp=hp, bidirectional=bidir)
        if Lt < T:                     # tail positions stay zero, as in the spec
            h = jnp.pad(h, ((0, (T - Lt) * Bp), (0, 0)))
        # self.dropout(output_i) is identity at inference / drop_rate=0.
        step_outs.append(h)

    ws, bias = _pack_conv_weights(params["linear_w"], params["linear_b"],
                                  num_step=num_step, out_dim=out_dim, hp=hp,
                                  num_dirs=num_dirs, dout_p=dout_p,
                                  dtype=mx_dtype)
    out = concat_pointwise_conv_rows(step_outs, ws, bias, dout_p=dout_p)
    out = out.reshape(T, Bp, dout_p)[:, :B, :out_dim]
    return jnp.transpose(out, (1, 0, 2))


# ----------------------------------------------------------------------------
# Pure-JAX reference (mirrors the PyTorch forward for a correctness check)
# ----------------------------------------------------------------------------
def _ref_layernorm(x, g, b, eps=1e-6):
    mean = jnp.mean(x, -1, keepdims=True)
    var = jnp.mean((x - mean) ** 2, -1, keepdims=True)
    return (x - mean) / jnp.sqrt(var + eps) * g + b


def _ref_lstm_seq(x_bt, w_ih, w_hh, b_ih, b_hh):
    H = w_hh.shape[1]
    x_tm = jnp.transpose(x_bt, (1, 0, 2))

    def step(carry, xt):
        h, c = carry
        g = xt @ w_ih.T + b_ih + h @ w_hh.T + b_hh
        i = jax.nn.sigmoid(g[:, :H])
        f = jax.nn.sigmoid(g[:, H:2 * H])
        gg = jnp.tanh(g[:, 2 * H:3 * H])
        o = jax.nn.sigmoid(g[:, 3 * H:])
        c = f * c + i * gg
        h = o * jnp.tanh(c)
        return (h, c), h

    N = x_tm.shape[1]
    init = (jnp.zeros((N, H), jnp.float32), jnp.zeros((N, H), jnp.float32))
    _, hs = jax.lax.scan(step, init, x_tm)
    return jnp.transpose(hs, (1, 0, 2))


def _ref_multilayer(x_bt, layers, bidirectional):
    h = x_bt
    for lp in layers:
        if bidirectional:
            fwd = _ref_lstm_seq(h, *lp[0])
            bwd = jnp.flip(_ref_lstm_seq(jnp.flip(h, axis=1), *lp[1]), axis=1)
            h = jnp.concatenate([fwd, bwd], axis=-1)
        else:
            h = _ref_lstm_seq(h, *lp)
    return h


def _ref_module(params, x):
    xn = _ref_layernorm(x, params["ln_gamma"], params["ln_beta"])
    B, T, _ = x.shape
    out_dim = params["out_dim"]
    outs = []
    for i in range(params["num_step"]):
        stride = i + 1
        L = T // stride
        Lt = L * stride
        out_i = jnp.zeros((B, T, out_dim), x.dtype)
        for j in range(stride):
            xj = xn[:, j:Lt:stride, :]
            hj = _ref_multilayer(xj, params["lstm"][i], params["bi_direction"])
            out_i = out_i.at[:, j:Lt:stride, :].set(hj)
        outs.append(out_i)
    cat = jnp.concatenate(outs, axis=-1)
    return cat @ params["linear_w"].T + params["linear_b"]


if __name__ == "__main__":
    key = jax.random.PRNGKey(0)
    k_param, k_x = jax.random.split(key)

    B, T, in_dim, out_dim = 2, 16, 32, 32
    num_layers, num_step, bi_direction = 2, 2, False

    params = init_multi_step_lstm_encoder(
        k_param, in_dim, out_dim, num_layers,
        num_step=num_step, bi_direction=bi_direction)
    x = jax.random.normal(k_x, (B, T, in_dim), dtype=jnp.float32)

    out = multi_step_lstm_encoder(params, x)
    out = jax.block_until_ready(out)

    ref = _ref_module(params, x)
    assert out.shape == (B, T, out_dim)
    err = float(jnp.max(jnp.abs(out - ref)))
    assert jnp.allclose(out, ref, rtol=2e-3, atol=2e-3), err

    print("KERNEL_OK")
</pallas_src>

<mosaic_0001>
module attributes {stable_mosaic.version = 11 : i64} {
  func.func @_layernorm_kernel(%arg0: i32, %arg1: memref<128x32xf32, #tpu.memory_space<vmem>>, %arg2: memref<1x32xf32, #tpu.memory_space<vmem>>, %arg3: memref<1x32xf32, #tpu.memory_space<vmem>>, %arg4: memref<128x32xf32, #tpu.memory_space<vmem>>) attributes {dimension_semantics = [#tpu.dimension_semantics<parallel>], iteration_bounds = array<i64: 1>, scalar_prefetch = 0 : i64, scratch_operands = 0 : i64, tpu.core_type = #tpu.core_type<tc>, window_params = [{transform_indices = @transform_0, window_bounds = array<i64: 128, 32>}, {pipeline_mode = #tpu.pipeline_mode<synchronous>, transform_indices = @transform_1, window_bounds = array<i64: 1, 32>}, {pipeline_mode = #tpu.pipeline_mode<synchronous>, transform_indices = @transform_2, window_bounds = array<i64: 1, 32>}, {transform_indices = @transform_3, window_bounds = array<i64: 128, 32>}]} {
    %c0 = arith.constant 0 : index
    %c0_0 = arith.constant 0 : index
    %0 = vector.load %arg1[%c0, %c0_0] : memref<128x32xf32, #tpu.memory_space<vmem>>, vector<128x32xf32>
    %cst = arith.constant dense<0.000000e+00> : vector<128xf32>
    %1 = vector.multi_reduction <add>, %0, %cst [1] : vector<128x32xf32> to vector<128xf32>
    %2 = vector.shape_cast %1 : vector<128xf32> to vector<128x1xf32>
    %cst_1 = arith.constant 3.200000e+01 : f32
    %3 = vector.broadcast %cst_1 : f32 to vector<128x1xf32>
    %4 = arith.divf %2, %3 : vector<128x1xf32>
    %5 = vector.broadcast %4 : vector<128x1xf32> to vector<128x32xf32>
    %6 = arith.subf %0, %5 : vector<128x32xf32>
    %7 = arith.mulf %6, %6 : vector<128x32xf32>
    %cst_2 = arith.constant dense<0.000000e+00> : vector<128xf32>
    %8 = vector.multi_reduction <add>, %7, %cst_2 [1] : vector<128x32xf32> to vector<128xf32>
    %9 = vector.shape_cast %8 : vector<128xf32> to vector<128x1xf32>
    %cst_3 = arith.constant 3.200000e+01 : f32
    %10 = vector.broadcast %cst_3 : f32 to vector<128x1xf32>
    %11 = arith.divf %9, %10 : vector<128x1xf32>
    %cst_4 = arith.constant 9.99999997E-7 : f32
    %12 = vector.broadcast %cst_4 : f32 to vector<128x1xf32>
    %13 = arith.addf %11, %12 : vector<128x1xf32>
    %14 = math.rsqrt %13 : vector<128x1xf32>
    %15 = vector.broadcast %14 : vector<128x1xf32> to vector<128x32xf32>
    %16 = arith.mulf %6, %15 : vector<128x32xf32>
    %c0_5 = arith.constant 0 : index
    %c0_6 = arith.constant 0 : index
    %17 = vector.load %arg2[%c0_5, %c0_6] : memref<1x32xf32, #tpu.memory_space<vmem>>, vector<1x32xf32>
    %18 = vector.broadcast %17 : vector<1x32xf32> to vector<128x32xf32>
    %19 = arith.mulf %16, %18 : vector<128x32xf32>
    %c0_7 = arith.constant 0 : index
    %c0_8 = arith.constant 0 : index
    %20 = vector.load %arg3[%c0_7, %c0_8] : memref<1x32xf32, #tpu.memory_space<vmem>>, vector<1x32xf32>
    %21 = vector.broadcast %20 : vector<1x32xf32> to vector<128x32xf32>
    %22 = arith.addf %19, %21 : vector<128x32xf32>
    %c0_9 = arith.constant 0 : index
    %c0_10 = arith.constant 0 : index
    %23 = vector.load %arg4[%c0_9, %c0_10] : memref<128x32xf32, #tpu.memory_space<vmem>>, vector<128x32xf32>
    tpu.vector_store %arg4[%c0_9, %c0_10], %22 {strides = array<i32>} : memref<128x32xf32, #tpu.memory_space<vmem>>, vector<128x32xf32>,
    return
  }
  func.func @transform_0(%arg0: i32) -> (i32, i32) {
    %c0_i32 = arith.constant 0 : i32
    %c0_i32_0 = arith.constant 0 : i32
    return %arg0, %c0_i32 : i32, i32
  }
  func.func @transform_1(%arg0: i32) -> (i32, i32) {
    %c0_i32 = arith.constant 0 : i32
    %c0_i32_0 = arith.constant 0 : i32
    %c0_i32_1 = arith.constant 0 : i32
    return %c0_i32, %c0_i32_0 : i32, i32
  }
  func.func @transform_2(%arg0: i32) -> (i32, i32) {
    %c0_i32 = arith.constant 0 : i32
    %c0_i32_0 = arith.constant 0 : i32
    %c0_i32_1 = arith.constant 0 : i32
    return %c0_i32, %c0_i32_0 : i32, i32
  }
  func.func @transform_3(%arg0: i32) -> (i32, i32) {
    %c0_i32 = arith.constant 0 : i32
    %c0_i32_0 = arith.constant 0 : i32
    return %arg0, %c0_i32 : i32, i32
  }
}

</mosaic_0001>

<bundles_post_ra>
// kernel: tpu_custom_call.1
= control target key start
LH: loop header
LB: loop body
LE: loop exit
PB: predicated region body
PF: predicated region fallthrough
CT: control target
= control target key end

     0   :  { %vm30_vm0 = vcmask 261120   ;;  %s666_s0 = inlined_call_operand.vmem [shape: f32[128,32], index: 0, kind: input, shape index: {}]   ;;  %s667_s1 = inlined_call_operand.vmem [shape: f32[1,32], index: 1, kind: input, shape index: {}]   ;;  %s668_s2 = inlined_call_operand.vmem [shape: f32[1,32], index: 2, kind: input, shape index: {}]   ;;  %s669_s3 = inlined_call_operand.vmem [shape: f32[128,32], index: 3, kind: output, shape index: {}]  }
   0x1   :  { %v14_v0 = vld [vmem:[%s666_s0] sm:$0xff]  ;;  %v16_v1 = vld [vmem:[%s666_s0 + $0x10] sm:$0xff]  ;;  %v15_v2 = vld [vmem:[%s666_s0 + $0x8] sm:$0xff] }
   0x2   :  { %v31_v3 = vsel %vm30_vm0, %v14_v0, 0.0  ;;  %v37_v4 = vsel %vm30_vm0, %v16_v1, 0.0  ;;  %v17_v5 = vld [vmem:[%s666_s0 + $0x18] sm:$0xff]  ;;  %v34_v6 = vsel %vm30_vm0, %v15_v2, 0.0  ;;  %v18_v8 = vld [vmem:[%s666_s0 + $0x20] sm:$0xff]  ;;  %v19_v9 = vld [vmem:[%s666_s0 + $0x28] sm:$0xff] }
   0x3   :  { %32 = vadd.xlane.f32.xlu0 %v31_v3  ;;  %38 = vadd.xlane.f32.xlu1 %v37_v4  ;;  %v40_v7 = vsel %vm30_vm0, %v17_v5, 0.0  ;;  %v43_v10 = vsel %vm30_vm0, %v18_v8, 0.0  ;;  %v46_v11 = vsel %vm30_vm0, %v19_v9, 0.0  ;;  %v387_v12 = vld [vmem:[%s666_s0 + $0x30] sm:$0xff]  ;;  %v392_v13 = vld [vmem:[%s666_s0 + $0x38] sm:$0xff]  ;;  %v401_v16 = vld [vmem:[%s666_s0 + $0x40] sm:$0xff] }
   0x4   :  { %v49_v14 = vsel %vm30_vm0, %v387_v12, 0.0  ;;  %v52_v15 = vsel %vm30_vm0, %v392_v13, 0.0  ;;  %v406_v17 = vld [vmem:[%s666_s0 + $0x48] sm:$0xff]  ;;  %v55_v18 = vsel %vm30_vm0, %v401_v16, 0.0  ;;  %v415_v20 = vld [vmem:[%s666_s0 + $0x50] sm:$0xff]  ;;  %v420_v21 = vld [vmem:[%s666_s0 + $0x58] sm:$0xff] }
   0x5   :  { %v58_v19 = vsel %vm30_vm0, %v406_v17, 0.0  ;;  %v61_v22 = vsel %vm30_vm0, %v415_v20, 0.0  ;;  %v64_v23 = vsel %vm30_vm0, %v420_v21, 0.0  ;;  %v429_v24 = vld [vmem:[%s666_s0 + $0x60] sm:$0xff]  ;;  %v434_v25 = vld [vmem:[%s666_s0 + $0x68] sm:$0xff]  ;;  %v443_v28 = vld [vmem:[%s666_s0 + $0x70] sm:$0xff] }
   0x6   :  { %v67_v26 = vsel %vm30_vm0, %v429_v24, 0.0  ;;  %v70_v27 = vsel %vm30_vm0, %v434_v25, 0.0  ;;  %v448_v29 = vld [vmem:[%s666_s0 + $0x78] sm:$0xff]  ;;  %v73_v30 = vsel %vm30_vm0, %v443_v28, 0.0 }
   0x7   :  { %35 = vadd.xlane.f32.xlu0 %v34_v6  ;;  %41 = vadd.xlane.f32.xlu1 %v40_v7  ;;  %v76_v31 = vsel %vm30_vm0, %v448_v29, 0.0 }
   0xb   :  { %44 = vadd.xlane.f32.xlu0 %v43_v10  ;;  %47 = vadd.xlane.f32.xlu1 %v46_v11 }
   0xf   :  { %50 = vadd.xlane.f32.xlu0 %v49_v14  ;;  %53 = vadd.xlane.f32.xlu1 %v52_v15 }
  0x13   :  { %56 = vadd.xlane.f32.xlu0 %v55_v18  ;;  %59 = vadd.xlane.f32.xlu1 %v58_v19 }
  0x17   :  { %62 = vadd.xlane.f32.xlu0 %v61_v22  ;;  %65 = vadd.xlane.f32.xlu1 %v64_v23 }
  0x1b   :  { %68 = vadd.xlane.f32.xlu0 %v67_v26  ;;  %71 = vadd.xlane.f32.xlu1 %v70_v27 }
  0x1f   :  { %74 = vadd.xlane.f32.xlu0 %v73_v30  ;;  %77 = vadd.xlane.f32.xlu1 %v76_v31 }
  0x90   :  { %v33_v32 = vpop.xlane.xlu0 %32  ;;  %v39_v33 = vpop.xlane.xlu1 %38 }
  0x91   :  { %v80_v34 = vmul.f32 0.03125, %v33_v32  ;;  %v82_v35 = vmul.f32 0.03125, %v39_v33 }
  0x93   :  { %v454_v36 = vsub.f32 %v14_v0, %v80_v34  ;;  %v456_v37 = vsub.f32 %v16_v1, %v82_v35 }
  0x94   :  { %v36_v38 = vpop.xlane.xlu0 %35  ;;  %v42_v39 = vpop.xlane.xlu1 %41 }
  0x95   :  { %v81_v40 = vmul.f32 0.03125, %v36_v38  ;;  %v83_v41 = vmul.f32 0.03125, %v42_v39  ;;  %v112_v42 = vmul.f32 %v454_v36, %v454_v36  ;;  %v114_v43 = vmul.f32 %v456_v37, %v456_v37 }
  0x97   :  { %v462_v44 = vsub.f32 %v15_v2, %v81_v40  ;;  %v464_v45 = vsub.f32 %v17_v5, %v83_v41  ;;  %v128_v46 = vsel %vm30_vm0, %v112_v42, 0.0  ;;  %v134_v49 = vsel %vm30_vm0, %v114_v43, 0.0 }
  0x98   :  { %129 = vadd.xlane.f32.xlu0 %v128_v46  ;;  %v45_v47 = vpop.xlane.xlu0 %44  ;;  %v48_v48 = vpop.xlane.xlu1 %47 }
  0x99   :  { %v84_v50 = vmul.f32 0.03125, %v45_v47  ;;  %v85_v51 = vmul.f32 0.03125, %v48_v48  ;;  %v113_v52 = vmul.f32 %v462_v44, %v462_v44  ;;  %v115_v53 = vmul.f32 %v464_v45, %v464_v45 }
  0x9b   :  { %v472_v54 = vsub.f32 %v18_v8, %v84_v50  ;;  %v474_v55 = vsub.f32 %v19_v9, %v85_v51  ;;  %v131_v56 = vsel %vm30_vm0, %v113_v52, 0.0  ;;  %v137_v59 = vsel %vm30_vm0, %v115_v53, 0.0 }
  0x9c   :  { %135 = vadd.xlane.f32.xlu0 %v134_v49  ;;  %132 = vadd.xlane.f32.xlu1 %v131_v56  ;;  %v51_v57 = vpop.xlane.xlu0 %50  ;;  %v54_v58 = vpop.xlane.xlu1 %53 }
  0x9d   :  { %v86_v60 = vmul.f32 0.03125, %v51_v57  ;;  %v87_v61 = vmul.f32 0.03125, %v54_v58  ;;  %v116_v62 = vmul.f32 %v472_v54, %v472_v54  ;;  %v117_v63 = vmul.f32 %v474_v55, %v474_v55 }
  0x9f   :  { %v483_v0 = vsub.f32 %v387_v12, %v86_v60  ;;  %v486_v1 = vsub.f32 %v392_v13, %v87_v61  ;;  %v140_v2 = vsel %vm30_vm0, %v116_v62, 0.0  ;;  %v143_v5 = vsel %vm30_vm0, %v117_v63, 0.0 }
  0xa0   :  { %138 = vadd.xlane.f32.xlu1 %v137_v59  ;;  %141 = vadd.xlane.f32.xlu0 %v140_v2  ;;  %v57_v3 = vpop.xlane.xlu0 %56  ;;  %v60_v4 = vpop.xlane.xlu1 %59 }
  0xa1   :  { %v88_v6 = vmul.f32 0.03125, %v57_v3  ;;  %v89_v7 = vmul.f32 0.03125, %v60_v4  ;;  %v118_v8 = vmul.f32 %v483_v0, %v483_v0  ;;  %v119_v9 = vmul.f32 %v486_v1, %v486_v1 }
  0xa3   :  { %v495_v10 = vsub.f32 %v401_v16, %v88_v6  ;;  %v498_v11 = vsub.f32 %v406_v17, %v89_v7  ;;  %v146_v12 = vsel %vm30_vm0, %v118_v8, 0.0  ;;  %v149_v15 = vsel %vm30_vm0, %v119_v9, 0.0 }
  0xa4   :  { %144 = vadd.xlane.f32.xlu1 %v143_v5  ;;  %147 = vadd.xlane.f32.xlu0 %v146_v12  ;;  %v63_v13 = vpop.xlane.xlu0 %62  ;;  %v66_v14 = vpop.xlane.xlu1 %65 }
  0xa5   :  { %v90_v18 = vmul.f32 0.03125, %v63_v13  ;;  %v91_v19 = vmul.f32 0.03125, %v66_v14  ;;  %v120_v22 = vmul.f32 %v495_v10, %v495_v10  ;;  %v121_v16 = vmul.f32 %v498_v11, %v498_v11  ;;  %v547_v14 = vld [vmem:[%s667_s1] ss:$0 sm:$0xff] }
  0xa7   :  { %v507_v23 = vsub.f32 %v415_v20, %v90_v18  ;;  %v510_v17 = vsub.f32 %v420_v21, %v91_v19  ;;  %v152_v26 = vsel %vm30_vm0, %v120_v22, 0.0  ;;  %v155_v31 = vsel %vm30_vm0, %v121_v16, 0.0 }
  0xa8   :  { %150 = vadd.xlane.f32.xlu1 %v149_v15  ;;  %153 = vadd.xlane.f32.xlu0 %v152_v26  ;;  %v69_v27 = vpop.xlane.xlu0 %68  ;;  %v72_v30 = vpop.xlane.xlu1 %71  ;;  %v553_v26 = vld [vmem:[%s668_s2] ss:$0 sm:$0xff] }
  0xa9   :  { %v92_v32 = vmul.f32 0.03125, %v69_v27  ;;  %v93_v33 = vmul.f32 0.03125, %v72_v30  ;;  %v122_v34 = vmul.f32 %v507_v23, %v507_v23  ;;  %v123_v20 = vmul.f32 %v510_v17, %v510_v17 }
  0xab   :  { %v519_v35 = vsub.f32 %v429_v24, %v92_v32  ;;  %v522_v21 = vsub.f32 %v434_v25, %v93_v33  ;;  %v158_v38 = vsel %vm30_vm0, %v122_v34, 0.0  ;;  %v161_v41 = vsel %vm30_vm0, %v123_v20, 0.0 }
  0xac   :  { %156 = vadd.xlane.f32.xlu1 %v155_v31  ;;  %159 = vadd.xlane.f32.xlu0 %v158_v38  ;;  %v75_v39 = vpop.xlane.xlu0 %74  ;;  %v78_v40 = vpop.xlane.xlu1 %77 }
  0xad   :  { %v94_v42 = vmul.f32 0.03125, %v75_v39  ;;  %v95_v43 = vmul.f32 0.03125, %v78_v40  ;;  %v124_v46 = vmul.f32 %v519_v35, %v519_v35  ;;  %v125_v24 = vmul.f32 %v522_v21, %v522_v21 }
  0xaf   :  { %v531_v47 = vsub.f32 %v443_v28, %v94_v42  ;;  %v534_v25 = vsub.f32 %v448_v29, %v95_v43  ;;  %v164_v48 = vsel %vm30_vm0, %v124_v46, 0.0  ;;  %v167_v49 = vsel %vm30_vm0, %v125_v24, 0.0 }
  0xb0   :  { %162 = vadd.xlane.f32.xlu1 %v161_v41  ;;  %165 = vadd.xlane.f32.xlu0 %v164_v48 }
  0xb1   :  { %v126_v50 = vmul.f32 %v531_v47, %v531_v47  ;;  %v127_v51 = vmul.f32 %v534_v25, %v534_v25 }
  0xb3   :  { %v170_v52 = vsel %vm30_vm0, %v126_v50, 0.0  ;;  %v173_v28 = vsel %vm30_vm0, %v127_v51, 0.0 }
  0xb4   :  { %168 = vadd.xlane.f32.xlu1 %v167_v49  ;;  %171 = vadd.xlane.f32.xlu0 %v170_v52 }
  0xb8   :  { %174 = vadd.xlane.f32.xlu1 %v173_v28 }
 0x125   :  { %v130_v29 = vpop.xlane.xlu0 %129 }
 0x126   :  { %v176_v53 = vmul.f32 0.03125, %v130_v29 }
 0x128   :  { %v192_v56 = vadd.f32 1e-06, %v176_v53 }
 0x129   :  { %v133_v57 = vpop.xlane.xlu1 %132  ;;  %v136_v58 = vpop.xlane.xlu0 %135 }
 0x12a   :  { %308 = vrsqrt.f32 %v192_v56  ;;  %v177_v59 = vmul.f32 0.03125, %v133_v57  ;;  %v178_v60 = vmul.f32 0.03125, %v136_v58 }
 0x12c   :  { %v193_v61 = vadd.f32 1e-06, %v177_v59  ;;  %v194_v62 = vadd.f32 1e-06, %v178_v60 }
 0x12d   :  { %v139_v63 = vpop.xlane.xlu1 %138  ;;  %v142_v2 = vpop.xlane.xlu0 %141 }
 0x12e   :  { %310 = vrsqrt.f32 %v193_v61  ;;  %v179_v3 = vmul.f32 0.03125, %v139_v63  ;;  %v180_v4 = vmul.f32 0.03125, %v142_v2 }
 0x12f   :  { %312 = vrsqrt.f32 %v194_v62 }
 0x130   :  { %v195_v5 = vadd.f32 1e-06, %v179_v3  ;;  %v196_v6 = vadd.f32 1e-06, %v180_v4 }
 0x131   :  { %v145_v7 = vpop.xlane.xlu1 %144  ;;  %v148_v8 = vpop.xlane.xlu0 %147 }
 0x132   :  { %314 = vrsqrt.f32 %v195_v5  ;;  %v181_v9 = vmul.f32 0.03125, %v145_v7  ;;  %v182_v12 = vmul.f32 0.03125, %v148_v8 }
 0x133   :  { %316 = vrsqrt.f32 %v196_v6 }
 0x134   :  { %v309_v13 = vpop.eup %308  ;;  %v197_v15 = vadd.f32 1e-06, %v181_v9  ;;  %v198_v18 = vadd.f32 1e-06, %v182_v12 }
 0x135   :  { %v224_v19 = vmul.f32 %v309_v13, %v454_v36  ;;  %v151_v22 = vpop.xlane.xlu1 %150  ;;  %v154_v16 = vpop.xlane.xlu0 %153 }
 0x136   :  { %318 = vrsqrt.f32 %v197_v15  ;;  %v183_v27 = vmul.f32 0.03125, %v151_v22  ;;  %v184_v30 = vmul.f32 0.03125, %v154_v16 }
 0x137   :  { %v247_v31 = vmul.f32 %v547_v14, %v224_v19  ;;  %320 = vrsqrt.f32 %v198_v18 }
 0x138   :  { %v311_v32 = vpop.eup %310  ;;  %v199_v33 = vadd.f32 1e-06, %v183_v27  ;;  %v200_v34 = vadd.f32 1e-06, %v184_v30 }
 0x139   :  { %v313_v20 = vpop.eup %312  ;;  %v270_v38 = vadd.f32 %v553_v26, %v247_v31  ;;  %v225_v36 = vmul.f32 %v311_v32, %v462_v44  ;;  %v157_v39 = vpop.xlane.xlu1 %156 }
 0x13a   :  { %v160_v40 = vpop.xlane.xlu0 %159  ;;  %v226_v41 = vmul.f32 %v313_v20, %v456_v37  ;;  %322 = vrsqrt.f32 %v199_v33  ;;  %v185_v42 = vmul.f32 0.03125, %v157_v39 }
 0x13b   :  { %v186_v43 = vmul.f32 0.03125, %v160_v40  ;;  %286 = vst.msk [vmem:[%s669_s3] sm:$0xff] %vm30_vm0, %v270_v38  ;;  %v248_v46 = vmul.f32 %v547_v14, %v225_v36  ;;  %324 = vrsqrt.f32 %v200_v34 }
 0x13c   :  { %v315_v24 = vpop.eup %314  ;;  %v249_v48 = vmul.f32 %v547_v14, %v226_v41  ;;  %v201_v49 = vadd.f32 1e-06, %v185_v42 }
 0x13d   :  { %v202_v44 = vadd.f32 1e-06, %v186_v43  ;;  %v317_v50 = vpop.eup %316  ;;  %v271_v51 = vadd.f32 %v553_v26, %v248_v46  ;;  %v227_v37 = vmul.f32 %v315_v24, %v464_v45  ;;  %v163_v52 = vpop.xlane.xlu1 %162 }
 0x13e   :  { %v166_v28 = vpop.xlane.xlu0 %165  ;;  %v272_v29 = vadd.f32 %v553_v26, %v249_v48  ;;  %v228_v53 = vmul.f32 %v317_v50, %v472_v54  ;;  %326 = vrsqrt.f32 %v201_v49  ;;  %v187_v56 = vmul.f32 0.03125, %v163_v52 }
 0x13f   :  { %287 = vst.msk [vmem:[%s669_s3 + $0x8] sm:$0xff] %vm30_vm0, %v271_v51  ;;  %v250_v57 = vmul.f32 %v547_v14, %v227_v37  ;;  %328 = vrsqrt.f32 %v202_v44  ;;  %v188_v58 = vmul.f32 0.03125, %v166_v28 }
 0x140   :  { %v319_v59 = vpop.eup %318  ;;  %288 = vst.msk [vmem:[%s669_s3 + $0x10] sm:$0xff] %vm30_vm0, %v272_v29  ;;  %v251_v45 = vmul.f32 %v547_v14, %v228_v53  ;;  %v203_v54 = vadd.f32 1e-06, %v187_v56 }
 0x141   :  { %v321_v60 = vpop.eup %320  ;;  %v273_v61 = vadd.f32 %v553_v26, %v250_v57  ;;  %v229_v62 = vmul.f32 %v319_v59, %v474_v55  ;;  %v204_v63 = vadd.f32 1e-06, %v188_v58  ;;  %v169_v2 = vpop.xlane.xlu1 %168 }
 0x142   :  { %v172_v3 = vpop.xlane.xlu0 %171  ;;  %v274_v4 = vadd.f32 %v553_v26, %v251_v45  ;;  %v230_v5 = vmul.f32 %v321_v60, %v483_v0  ;;  %330 = vrsqrt.f32 %v203_v54  ;;  %v189_v6 = vmul.f32 0.03125, %v169_v2 }
 0x143   :  { %289 = vst.msk [vmem:[%s669_s3 + $0x18] sm:$0xff] %vm30_vm0, %v273_v61  ;;  %v252_v7 = vmul.f32 %v547_v14, %v229_v62  ;;  %332 = vrsqrt.f32 %v204_v63  ;;  %v190_v8 = vmul.f32 0.03125, %v172_v3 }
 0x144   :  { %v323_v9 = vpop.eup %322  ;;  %290 = vst.msk [vmem:[%s669_s3 + $0x20] sm:$0xff] %vm30_vm0, %v274_v4  ;;  %v253_v55 = vmul.f32 %v547_v14, %v230_v5  ;;  %v205_v0 = vadd.f32 1e-06, %v189_v6 }
 0x145   :  { %v325_v12 = vpop.eup %324  ;;  %v275_v13 = vadd.f32 %v553_v26, %v252_v7  ;;  %v231_v15 = vmul.f32 %v323_v9, %v486_v1  ;;  %v206_v18 = vadd.f32 1e-06, %v190_v8  ;;  %v175_v19 = vpop.xlane.xlu1 %174 }
 0x146   :  { %v276_v22 = vadd.f32 %v553_v26, %v253_v55  ;;  %v232_v16 = vmul.f32 %v325_v12, %v495_v10  ;;  %334 = vrsqrt.f32 %v205_v0  ;;  %v191_v27 = vmul.f32 0.03125, %v175_v19 }
 0x147   :  { %291 = vst.msk [vmem:[%s669_s3 + $0x28] sm:$0xff] %vm30_vm0, %v275_v13  ;;  %v254_v30 = vmul.f32 %v547_v14, %v231_v15  ;;  %336 = vrsqrt.f32 %v206_v18 }
 0x148   :  { %v327_v31 = vpop.eup %326  ;;  %292 = vst.msk [vmem:[%s669_s3 + $0x30] sm:$0xff] %vm30_vm0, %v276_v22  ;;  %v255_v1 = vmul.f32 %v547_v14, %v232_v16  ;;  %v207_v32 = vadd.f32 1e-06, %v191_v27 }
 0x149   :  { %v329_v10 = vpop.eup %328  ;;  %v277_v33 = vadd.f32 %v553_v26, %v254_v30  ;;  %v233_v34 = vmul.f32 %v327_v31, %v498_v11 }
 0x14a   :  { %v278_v20 = vadd.f32 %v553_v26, %v255_v1  ;;  %v234_v38 = vmul.f32 %v329_v10, %v507_v23  ;;  %338 = vrsqrt.f32 %v207_v32 }
 0x14b   :  { %293 = vst.msk [vmem:[%s669_s3 + $0x38] sm:$0xff] %vm30_vm0, %v277_v33  ;;  %v256_v36 = vmul.f32 %v547_v14, %v233_v34 }
 0x14c   :  { %v331_v39 = vpop.eup %330  ;;  %294 = vst.msk [vmem:[%s669_s3 + $0x40] sm:$0xff] %vm30_vm0, %v278_v20  ;;  %v257_v11 = vmul.f32 %v547_v14, %v234_v38 }
 0x14d   :  { %v333_v40 = vpop.eup %332  ;;  %v279_v41 = vadd.f32 %v553_v26, %v256_v36  ;;  %v235_v23 = vmul.f32 %v331_v39, %v510_v17 }
 0x14e   :  { %v280_v42 = vadd.f32 %v553_v26, %v257_v11  ;;  %v236_v43 = vmul.f32 %v333_v40, %v519_v35 }
 0x14f   :  { %295 = vst.msk [vmem:[%s669_s3 + $0x48] sm:$0xff] %vm30_vm0, %v279_v41  ;;  %v258_v46 = vmul.f32 %v547_v14, %v235_v23 }
 0x150   :  { %v335_v24 = vpop.eup %334  ;;  %296 = vst.msk [vmem:[%s669_s3 + $0x50] sm:$0xff] %vm30_vm0, %v280_v42  ;;  %v259_v48 = vmul.f32 %v547_v14, %v236_v43 }
 0x151   :  { %v337_v17 = vpop.eup %336  ;;  %v281_v49 = vadd.f32 %v553_v26, %v258_v46  ;;  %v237_v35 = vmul.f32 %v335_v24, %v522_v21 }
 0x152   :  { %v282_v44 = vadd.f32 %v553_v26, %v259_v48  ;;  %v238_v50 = vmul.f32 %v337_v17, %v531_v47 }
 0x153   :  { %297 = vst.msk [vmem:[%s669_s3 + $0x58] sm:$0xff] %vm30_vm0, %v281_v49  ;;  %v260_v51 = vmul.f32 %v547_v14, %v237_v35 }
 0x154   :  { %v339_v37 = vpop.eup %338  ;;  %298 = vst.msk [vmem:[%s669_s3 + $0x60] sm:$0xff] %vm30_vm0, %v282_v44  ;;  %v261_v52 = vmul.f32 %v547_v14, %v238_v50 }
 0x155   :  { %v283_v21 = vadd.f32 %v553_v26, %v260_v51  ;;  %v239_v28 = vmul.f32 %v339_v37, %v534_v25 }
 0x156   :  { %v284_v47 = vadd.f32 %v553_v26, %v261_v52 }
 0x157   :  { %299 = vst.msk [vmem:[%s669_s3 + $0x68] sm:$0xff] %vm30_vm0, %v283_v21  ;;  %v262_v29 = vmul.f32 %v547_v14, %v239_v28 }
 0x158   :  { %300 = vst.msk [vmem:[%s669_s3 + $0x70] sm:$0xff] %vm30_vm0, %v284_v47 }
 0x159   :  { %v285_v53 = vadd.f32 %v553_v26, %v262_v29 }
 0x15b   :  { %301 = vst.msk [vmem:[%s669_s3 + $0x78] sm:$0xff] %vm30_vm0, %v285_v53 }

</bundles_post_ra>
